<compile_context>
chip_gen: v5e
topology: v5e:2x2
jax: 0.10.0
libtpu: 0.0.40
codegen_flags: <defaults>
</compile_context>

<pallas_src>
import jax
import jax.numpy as jnp
from jax.experimental import pallas as pl
from jax.experimental.pallas import tpu as pltpu

IN_FEATURES = 5
HIDDEN = 64
OUT_FEATURES = 4
K_PAD = 8            # feature dim padded 5 -> 8 (sublane-aligned, zero rows are no-ops)
OUT_PAD = 8          # output dim padded 4 -> 8 (zero rows, sliced off in the wrapper)
LANE = 128
MAX_TILE_B = 16384   # batch rows (lanes) per grid step


def _round_up(x, m):
    return (x + m - 1) // m * m


def _cdiv(a, b):
    return -(-a // b)


def mlp_kernel(xt_ref, w1t_ref, b1_ref, w2t_ref, b2_ref, outt_ref):
    """One batch tile, feature-major (batch on the 128-lane axis).

    xt_ref  : (K_PAD,  TILE_B)   io dtype
    w1t_ref : (HIDDEN, K_PAD)    compute dtype (W1^T, zero-padded 5->8)
    b1_ref  : (HIDDEN, 1)        f32
    w2t_ref : (OUT_PAD, HIDDEN)  compute dtype (W2^T, zero-padded 4->8)
    b2_ref  : (OUT_PAD, 1)       f32
    outt_ref: (OUT_PAD, TILE_B)  io dtype
    """
    x = xt_ref[...]
    if x.dtype != w1t_ref.dtype:            # tiny: only K_PAD=8 sublane rows
        x = x.astype(w1t_ref.dtype)
    # Layer 1 on the MXU with f32 accumulation; bias + ReLU in f32 on the VPU.
    h = jnp.dot(w1t_ref[...], x, preferred_element_type=jnp.float32)   # (64, TILE_B)
    h = jnp.maximum(h + b1_ref[...], 0.0)
    # Layer 2: feed the MXU compute-dtype operands (single cast pass of h).
    h = h.astype(w2t_ref.dtype)
    q = jnp.dot(w2t_ref[...], h, preferred_element_type=jnp.float32) + b2_ref[...]
    outt_ref[...] = q.astype(outt_ref.dtype)                           # lane-dense store


def mlp_forward(x, w1, b1, w2, b2, *, io_dtype=None, compute_dtype=jnp.bfloat16,
                max_tile_b=MAX_TILE_B):
    """Flatten -> Linear(5,64) -> ReLU -> Linear(64,4).  Returns (B, 4) in io_dtype."""
    B = x.shape[0]
    x2d = x.reshape(B, -1)                                   # nn.Flatten
    assert x2d.shape[1] == IN_FEATURES, f"expected {IN_FEATURES} features, got {x2d.shape[1]}"

    io_dtype = jnp.dtype(x2d.dtype) if io_dtype is None else jnp.dtype(io_dtype)
    compute_dtype = io_dtype if compute_dtype is None else jnp.dtype(compute_dtype)

    # Tiling: >= 2 grid steps (both v7x TensorCores get work), lane-aligned tiles,
    # tile capped so the f32 hidden temporaries stay at a few MiB of VMEM.
    steps = max(2, _cdiv(B, max_tile_b))
    tile_b = _round_up(_cdiv(B, steps), LANE)
    b_pad = steps * tile_b

    # Feature-major input slab: one fused pad+transpose pass (see TODO in header).
    xt = jnp.pad(x2d.astype(io_dtype).T,
                 ((0, K_PAD - IN_FEATURES), (0, b_pad - B)))           # (8, b_pad)

    w1 = jnp.asarray(w1, jnp.float32).reshape(IN_FEATURES, HIDDEN)
    w2 = jnp.asarray(w2, jnp.float32).reshape(HIDDEN, OUT_FEATURES)
    b1v = jnp.asarray(b1, jnp.float32).reshape(HIDDEN, 1)
    b2v = jnp.asarray(b2, jnp.float32).reshape(OUT_FEATURES, 1)
    w1t = jnp.pad(w1.T, ((0, 0), (0, K_PAD - IN_FEATURES))).astype(compute_dtype)     # (64, 8)
    w2t = jnp.pad(w2.T, ((0, OUT_PAD - OUT_FEATURES), (0, 0))).astype(compute_dtype)  # (8, 64)
    b2p = jnp.pad(b2v, ((0, OUT_PAD - OUT_FEATURES), (0, 0)))                         # (8, 1)

    io_bytes = io_dtype.itemsize
    w_bytes = jnp.dtype(compute_dtype).itemsize
    cost = pl.CostEstimate(
        flops=2 * b_pad * (K_PAD * HIDDEN + HIDDEN * OUT_PAD),   # FLOPs actually executed
        transcendentals=0,
        bytes_accessed=(xt.size * io_bytes + OUT_PAD * b_pad * io_bytes
                        + (w1t.size + w2t.size) * w_bytes
                        + (b1v.size + b2p.size) * 4),
    )

    out_t = pl.pallas_call(
        mlp_kernel,
        out_shape=jax.ShapeDtypeStruct((OUT_PAD, b_pad), io_dtype),
        grid=(steps,),
        in_specs=[
            pl.BlockSpec((K_PAD, tile_b), lambda i: (0, i)),       # xT: streamed over lanes
            pl.BlockSpec((HIDDEN, K_PAD), lambda i: (0, 0)),       # W1^T: VMEM-resident (~2 KiB)
            pl.BlockSpec((HIDDEN, 1), lambda i: (0, 0)),           # b1:   resident
            pl.BlockSpec((OUT_PAD, HIDDEN), lambda i: (0, 0)),     # W2^T: resident (~2 KiB)
            pl.BlockSpec((OUT_PAD, 1), lambda i: (0, 0)),          # b2:   resident
        ],
        out_specs=pl.BlockSpec((OUT_PAD, tile_b), lambda i: (0, i)),  # lane-dense output
        compiler_params=pltpu.CompilerParams(
            dimension_semantics=("parallel",),     # shard batch tiles across TCs on v7x
            vmem_limit_bytes=32 * 1024 * 1024,     # safe on v5e/v6e/v7x; usage is << this
        ),
        cost_estimate=cost,
    )(xt, w1t, b1v, w2t, b2p)

    # Drop the padded output rows / batch columns; back to batch-major (B, 4).
    return out_t[:OUT_FEATURES, :B].T


def init_params(key):
    """PyTorch nn.Linear default init: U[-1/sqrt(fan_in), 1/sqrt(fan_in)]."""
    k1, k2, k3, k4 = jax.random.split(key, 4)
    bound1 = 1.0 / jnp.sqrt(5.0)
    bound2 = 1.0 / jnp.sqrt(64.0)
    w1 = jax.random.uniform(k1, (IN_FEATURES, HIDDEN), jnp.float32, -bound1, bound1)
    b1 = jax.random.uniform(k2, (HIDDEN,), jnp.float32, -bound1, bound1)
    w2 = jax.random.uniform(k3, (HIDDEN, OUT_FEATURES), jnp.float32, -bound2, bound2)
    b2 = jax.random.uniform(k4, (OUT_FEATURES,), jnp.float32, -bound2, bound2)
    return w1, b1, w2, b2


if __name__ == "__main__":
    key = jax.random.PRNGKey(0)
    kx, kp, kx2 = jax.random.split(key, 3)

    # Small example consistent with the module: batch=2 states of 5 features.
    x = jax.random.normal(kx, (2, IN_FEATURES), jnp.float32)
    w1, b1, w2, b2 = init_params(kp)
    ref = jnp.maximum(x @ w1 + b1, 0.0) @ w2 + b2

    # 1) Bit-faithful f32 path (exact semantics of the PyTorch module).
    q_exact = mlp_forward(x, w1, b1, w2, b2, compute_dtype=jnp.float32)
    jax.block_until_ready(q_exact)
    assert q_exact.shape == (2, OUT_FEATURES)
    assert jnp.allclose(q_exact, ref, atol=1e-5), "f32 mismatch vs reference"

    # 2) Default fast path: f32 HBM I/O, bf16 MXU operands, f32 accumulation.
    q_fast = mlp_forward(x, w1, b1, w2, b2)
    jax.block_until_ready(q_fast)
    assert q_fast.dtype == jnp.float32
    assert jnp.allclose(q_fast, ref, atol=5e-2, rtol=5e-2), "bf16-MXU mismatch vs reference"

    # 3) bf16 HBM-facing I/O (halves x/out traffic once the kernel is mem-bound).
    q_bf16 = mlp_forward(x, w1, b1, w2, b2, io_dtype=jnp.bfloat16)
    jax.block_until_ready(q_bf16)
    assert q_bf16.dtype == jnp.bfloat16
    assert jnp.allclose(q_bf16.astype(jnp.float32), ref, atol=1e-1, rtol=1e-1), \
        "bf16-io mismatch vs reference"

    # 4) Larger, ragged batch: exercises the multi-step grid and padding paths.
    xb = jax.random.normal(kx2, (777, IN_FEATURES), jnp.float32)
    refb = jnp.maximum(xb @ w1 + b1, 0.0) @ w2 + b2
    qb = mlp_forward(xb, w1, b1, w2, b2, compute_dtype=jnp.float32)
    jax.block_until_ready(qb)
    assert qb.shape == (777, OUT_FEATURES)
    assert jnp.allclose(qb, refb, atol=1e-5), "f32 mismatch vs reference (B=777)"

    print("KERNEL_OK")
</pallas_src>

<mosaic_0001>
module attributes {stable_mosaic.version = 11 : i64} {
  func.func @mlp_kernel(%arg0: i32, %arg1: memref<8x128xf32, #tpu.memory_space<vmem>>, %arg2: memref<64x8xf32, #tpu.memory_space<vmem>>, %arg3: memref<64x1xf32, #tpu.memory_space<vmem>>, %arg4: memref<8x64xf32, #tpu.memory_space<vmem>>, %arg5: memref<8x1xf32, #tpu.memory_space<vmem>>, %arg6: memref<8x128xf32, #tpu.memory_space<vmem>>) attributes {dimension_semantics = [#tpu.dimension_semantics<parallel>], iteration_bounds = array<i64: 2>, scalar_prefetch = 0 : i64, scratch_operands = 0 : i64, tpu.core_type = #tpu.core_type<tc>, window_params = [{transform_indices = @transform_0, window_bounds = array<i64: 8, 128>}, {pipeline_mode = #tpu.pipeline_mode<synchronous>, transform_indices = @transform_1, window_bounds = array<i64: 64, 8>}, {pipeline_mode = #tpu.pipeline_mode<synchronous>, transform_indices = @transform_2, window_bounds = array<i64: 64, 1>}, {pipeline_mode = #tpu.pipeline_mode<synchronous>, transform_indices = @transform_3, window_bounds = array<i64: 8, 64>}, {pipeline_mode = #tpu.pipeline_mode<synchronous>, transform_indices = @transform_4, window_bounds = array<i64: 8, 1>}, {transform_indices = @transform_5, window_bounds = array<i64: 8, 128>}]} {
    %c0 = arith.constant 0 : index
    %c0_0 = arith.constant 0 : index
    %0 = vector.load %arg1[%c0, %c0_0] : memref<8x128xf32, #tpu.memory_space<vmem>>, vector<8x128xf32>
    %c0_1 = arith.constant 0 : index
    %c0_2 = arith.constant 0 : index
    %1 = vector.load %arg2[%c0_1, %c0_2] : memref<64x8xf32, #tpu.memory_space<vmem>>, vector<64x8xf32>
    %cst = arith.constant dense<0.000000e+00> : vector<64x128xf32>
    %2 = tpu.matmul %1, %0, %cst {dimension_numbers = #tpu.dot_dimension_numbers<[1], [0], [0], [1], [0, 0, 1, 1], [], []>} : vector<64x8xf32>, vector<8x128xf32>, vector<64x128xf32> -> vector<64x128xf32>
    %c0_3 = arith.constant 0 : index
    %c0_4 = arith.constant 0 : index
    %3 = vector.load %arg3[%c0_3, %c0_4] : memref<64x1xf32, #tpu.memory_space<vmem>>, vector<64x1xf32>
    %4 = vector.broadcast %3 : vector<64x1xf32> to vector<64x128xf32>
    %5 = arith.addf %2, %4 : vector<64x128xf32>
    %cst_5 = arith.constant 0.000000e+00 : f32
    %6 = vector.broadcast %cst_5 : f32 to vector<64x128xf32>
    %7 = arith.maximumf %5, %6 : vector<64x128xf32>
    %c0_6 = arith.constant 0 : index
    %c0_7 = arith.constant 0 : index
    %8 = vector.load %arg4[%c0_6, %c0_7] : memref<8x64xf32, #tpu.memory_space<vmem>>, vector<8x64xf32>
    %cst_8 = arith.constant dense<0.000000e+00> : vector<8x128xf32>
    %9 = tpu.matmul %8, %7, %cst_8 {dimension_numbers = #tpu.dot_dimension_numbers<[1], [0], [0], [1], [0, 0, 1, 1], [], []>} : vector<8x64xf32>, vector<64x128xf32>, vector<8x128xf32> -> vector<8x128xf32>
    %c0_9 = arith.constant 0 : index
    %c0_10 = arith.constant 0 : index
    %10 = vector.load %arg5[%c0_9, %c0_10] : memref<8x1xf32, #tpu.memory_space<vmem>>, vector<8x1xf32>
    %11 = vector.broadcast %10 : vector<8x1xf32> to vector<8x128xf32>
    %12 = arith.addf %9, %11 : vector<8x128xf32>
    %c0_11 = arith.constant 0 : index
    %c0_12 = arith.constant 0 : index
    %13 = vector.load %arg6[%c0_11, %c0_12] : memref<8x128xf32, #tpu.memory_space<vmem>>, vector<8x128xf32>
    tpu.vector_store %arg6[%c0_11, %c0_12], %12 {strides = array<i32>} : memref<8x128xf32, #tpu.memory_space<vmem>>, vector<8x128xf32>,
    return
  }
  func.func @transform_0(%arg0: i32) -> (i32, i32) {
    %c0_i32 = arith.constant 0 : i32
    %c0_i32_0 = arith.constant 0 : i32
    return %c0_i32, %arg0 : i32, i32
  }
  func.func @transform_1(%arg0: i32) -> (i32, i32) {
    %c0_i32 = arith.constant 0 : i32
    %c0_i32_0 = arith.constant 0 : i32
    %c0_i32_1 = arith.constant 0 : i32
    return %c0_i32, %c0_i32_0 : i32, i32
  }
  func.func @transform_2(%arg0: i32) -> (i32, i32) {
    %c0_i32 = arith.constant 0 : i32
    %c0_i32_0 = arith.constant 0 : i32
    %c0_i32_1 = arith.constant 0 : i32
    return %c0_i32, %c0_i32_0 : i32, i32
  }
  func.func @transform_3(%arg0: i32) -> (i32, i32) {
    %c0_i32 = arith.constant 0 : i32
    %c0_i32_0 = arith.constant 0 : i32
    %c0_i32_1 = arith.constant 0 : i32
    return %c0_i32, %c0_i32_0 : i32, i32
  }
  func.func @transform_4(%arg0: i32) -> (i32, i32) {
    %c0_i32 = arith.constant 0 : i32
    %c0_i32_0 = arith.constant 0 : i32
    %c0_i32_1 = arith.constant 0 : i32
    return %c0_i32, %c0_i32_0 : i32, i32
  }
  func.func @transform_5(%arg0: i32) -> (i32, i32) {
    %c0_i32 = arith.constant 0 : i32
    %c0_i32_0 = arith.constant 0 : i32
    return %c0_i32, %arg0 : i32, i32
  }
}

</mosaic_0001>

<bundles_post_ra>
// kernel: tpu_custom_call.1
= control target key start
LH: loop header
LB: loop body
LE: loop exit
PB: predicated region body
PF: predicated region fallthrough
CT: control target
= control target key end

     0   :  { %10 = vsyncpa [#allocation3], 0  ;;  %s764_s0 = inlined_call_operand.vmem [shape: f32[8,256], index: 0, kind: input, shape index: {}]   ;;  %s765_s1 = inlined_call_operand.vmem [shape: f32[64,8], index: 1, kind: input, shape index: {}]   ;;  %s766_s2 = inlined_call_operand.vmem [shape: f32[64,1], index: 2, kind: input, shape index: {}]   ;;  %s767_s3 = inlined_call_operand.vmem [shape: f32[8,64], index: 3, kind: input, shape index: {}]   ;;  %s768_s4 = inlined_call_operand.vmem [shape: f32[8,1], index: 4, kind: input, shape index: {}]   ;;  %s769_s5 = inlined_call_operand.hbm [shape: f32[8,256], index: 5, kind: output, shape index: {}]  }
   0x1   :  { %12 = vsyncpa [#allocation3 + $0x1], 0  ;;  %s617_s18 = smov 0   ;;  %s619_s19 = smov 0  }
   0x2   :  { %s621_s20 = smov 0   ;;  %s623_s21 = smov 0  }
   0x3 LB: > { %s638_s22 = sadd.s32 4294967295, %s584_s21   ;;  %s458_s23 = sadd.s32 4294967294, %s584_s21   ;;  %s584_s21 = sphi %s623_s21, %s775_s21   ;;  %s580_s20 = sphi %s621_s20, %s774_s20   ;;  %s576_s19 = sphi %s619_s19, %s773_s19   ;;  %s572_s18 = sphi %s617_s18, %s772_s18  }
   0x4   : > { %s642_s24 = sadd.s32 1, %s584_s21   ;;  %s135_s25 = sadd.s32 1, %s580_s20 }
   0x5   : > { %s132_s26 = ssub.s32 %s584_s21, %s642_s24  ;;  %p145_p0 = scmp.ne.s32.totalorder %s580_s20, %s576_s19 }
   0x6   : > { %p133_p1 = scmp.eq.s32.totalorder %s132_s26, 0  ;;  %p146_p2 = scmp.eq.s32.totalorder %s638_s22, 1 }
   0x7   : > { %p151_p3 = scmp.ne.s32.totalorder %s576_s19, %s572_s18  ;;  %p152_p4 = scmp.eq.s32.totalorder %s458_s23, 1 }
   0x8   : > { %s653_s27 = scalar_select %p133_p1, %s580_s20, %s135_s25  }
   0x9   : > { %p655_p5 = por %p146_p2, %p145_p0  ;;  %p659_p6 = por %p152_p4, %p151_p3 }
   0xa   : > { %p461_p7 = scmp.ge.s32.totalorder %s584_s21, 1  ;;  %p189_p8 = scmp.lt.s32.totalorder %s584_s21, 3 }
   0xc   : > { %p190_p9 = pnand %p461_p7, %p189_p8 }
   0xd   : > { %p216_p10 = scmp.lt.s32.totalorder (!%p190_p9), %s638_s22, 1  ;;  %s213_s14 = sand.u32 (!%p190_p9), 1, %s576_s19  }
   0xe   : > { %193 = sbr.rel (%p190_p9) target bundleno = 319 (0x13f), region = 40  ;;  %s474_s16 = sshll.u32 (!%p190_p9), %s638_s22, 3 }
   0xf   : > { %s394_s25 = scalar_lea.hbm (!%p190_p9), %s769_s5, %s474_s16  ;;  %s384_s7 = scalar_lea.sflag (!%p190_p9), [#allocation3], %s213_s14 }
  0x10   : > { %s398_s6 = sshll.u32 (!%p190_p9), %s394_s25, 4  ;;  %s542_s11 = scalar_lea.hbm (!%p190_p9), %s769_s5, 16  ;;  %s399_s6 = int_to_ptr.hbm [resolvable:$true] %s398_s6 }
  0x11   : > { %s536_s8 = sshra.s32 (!%p190_p9), %s399_s6, 4  ;;  %s537_s8 = int_to_ptr.hbm [resolvable:$true] %s536_s8 }
  0x12   : > { %p543_p0 = scmp.lt.s32.totalorder (!%p190_p9), %s537_s8, %s769_s5 }
  0x13   : > { %v586_v0 = vmov 0   ;;  %v236_v1 = vld [vmem:[%s766_s2 + $0x38] sm:$0xff]  ;;  %v234_v2 = vld [vmem:[%s766_s2 + $0x28] sm:$0xff]  ;;  %s217_s9 = scalar_select %p216_p10, %s638_s22, 1  ;;  %vm277_vm0 = vcmask 64512   ;;  %v227_v5 = vld [vmem:[%s765_s1 + $0x30] sm:$0xff] }
  0x14   : > { %520 = vset.pattern.permute.xlu1 %v586_v0  ;;  %519 = vset.pattern.permute.xlu0 %v586_v0  ;;  %v232_v3 = vld [vmem:[%s766_s2 + $0x18] sm:$0xff]  ;;  %v221_v7 = vld [vmem:[%s765_s1] sm:$0xff]  ;;  %v235_v8 = vld [vmem:[%s766_s2 + $0x30] sm:$0xff]  ;;  %vm358_vm1 = vcmask 523264  }
  0x15   : > { %274 = vperm.xlu0 %519, %v236_v1   ;;  %264 = vperm.xlu1 %520, %v234_v2   ;;  %s463_s10 = sshll.u32 %s217_s9, 3  ;;  %v224_v4 = vld [vmem:[%s765_s1 + $0x18] sm:$0xff]  ;;  %v233_v9 = vld [vmem:[%s766_s2 + $0x20] sm:$0xff]  ;;  %v231_v10 = vld [vmem:[%s766_s2 + $0x10] sm:$0xff]  ;;  %s538_s9 = scalar_lea.hbm %s537_s8, 8 }
  0x16   : > { %521 = vset.pattern.permute.xlu2 %v586_v0  ;;  %s219_s15 = scalar_lea.vmem %s764_s0, %s463_s10  ;;  %v225_v11 = vld [vmem:[%s765_s1 + $0x20] sm:$0xff]  ;;  %v228_v12 = vld [vmem:[%s765_s1 + $0x38] sm:$0xff]  ;;  %v222_v13 = vld [vmem:[%s765_s1 + $0x8] sm:$0xff]  ;;  %p539_p11 = scmp.ne.s32.totalorder %s537_s8, %s538_s9 }
  0x17   : > { %254 = vperm.xlu2 %521, %v232_v3   ;;  %v220_v6 = vld [vmem:[%s219_s15] sm:$0xff]  ;;  %v230_v14 = vld [vmem:[%s766_s2 + $0x8] sm:$0xff]  ;;  %v223_v18 = vld [vmem:[%s765_s1 + $0x10] sm:$0xff]  ;;  %s462_s15 = sshll.u32 %s213_s14, 3  ;;  %p544_p1 = scmp.lt.s32.totalorder %s542_s11, %s538_s9 }
  0x18   : > { %477 = vmatpush.msra.mxu2 %v220_v6  ;;  %478 = vmatpush.msra.mxu3 %v220_v6  ;;  %v229_v15 = vld [vmem:[%s766_s2] sm:$0xff]  ;;  %v226_v17 = vld [vmem:[%s765_s1 + $0x28] sm:$0xff]  ;;  %s215_s26 = scalar_lea.vmem [#allocation2], %s462_s15  ;;  %p540_p12 = pnand %p539_p11, %p655_p5 }
  0x19   : > { %467 = vmatmul.msk.f32.vlgmr.msra.gmra.mxu2 %vm277_vm0, %v224_v4  ;;  %470 = vmatmul.msk.f32.vlgmr.msra.gmra.mxu3 %vm277_vm0, %v227_v5  ;;  %v352_v16 = vld [vmem:[%s768_s4] sm:$0xff]  ;;  %s396_s30 = sshll.u32 %s215_s26, 4  ;;  %p545_p2 = por %p544_p1, %p543_p0  ;;  %s397_s30 = int_to_ptr.vmem [resolvable:$true] %s396_s30 }
  0x1a   : > { %317 = vmatpush.msra.mxu0 %v220_v6  ;;  %v351_v51 = vld [vmem:[%s767_s3] sm:$0xff]  ;;  %p541_p13 = pneg %p540_p12 }
  0x1b   : > { %464 = vmatmul.msk.f32.vlgmr.msra.gmra.mxu0 %vm277_vm0, %v221_v7 }
  0x1c   : > { %p546_p3 = pnand %p545_p2, %p541_p13 }
  0x1d   : > { %269 = vperm.xlu0 %519, %v235_v8   ;;  %259 = vperm.xlu1 %520, %v233_v9  }
  0x1f   : > { %249 = vperm.xlu2 %521, %v231_v10  }
  0x21   : > { %468 = vmatmul.msk.f32.gmra.mxu2 %vm277_vm0, %v225_v11  ;;  %471 = vmatmul.msk.f32.gmra.mxu3 %vm277_vm0, %v228_v12 }
  0x23   : > { %465 = vmatmul.msk.f32.gmra.mxu0 %vm277_vm0, %v222_v13 }
  0x25   : > { %244 = vperm.xlu0 %519, %v230_v14   ;;  %239 = vperm.xlu1 %520, %v229_v15  }
  0x27   : > { %355 = vperm.xlu2 %521, %v352_v16  }
  0x29   : > { %469 = vmatmul.msk.f32.gmra.mxu2 %vm277_vm0, %v226_v17 }
  0x2b   : > { %466 = vmatmul.msk.f32.gmra.mxu0 %vm277_vm0, %v223_v18 }
  0x71   : > { %v255_v30 = vpop.permute.xlu2 %254 }
  0x79   : > { %v250_v40 = vpop.permute.xlu2 %249 }
  0x81   : > { %v356_v52 = vpop.permute.xlu2 %355 }
  0x87   : > { %v275_v19 = vpop.permute.xlu0 %274  ;;  %v265_v23 = vpop.permute.xlu1 %264 }
  0x8f   : > { %v270_v24 = vpop.permute.xlu0 %269  ;;  %v260_v32 = vpop.permute.xlu1 %259 }
  0x97   : > { %v245_v41 = vpop.permute.xlu0 %244  ;;  %v240_v44 = vpop.permute.xlu1 %239 }
  0x98   : > { %v319_v20 = vpop.f32.mrf.mxu0 }
  0x99   : > { %v320_v47 = vadd.f32 %v319_v20, %v240_v44 }
  0x9b   : > { %v343_v50 = vmax.f32 %v320_v47, 0.0 }
  0x9c   : > { %v328_v21 = vpop.f32.mrf.mxu2  ;;  %v337_v22 = vpop.f32.mrf.mxu3 }
  0x9d   : > { %v338_v28 = vadd.f32 %v337_v22, %v270_v24  ;;  %v329_v38 = vadd.f32 %v328_v21, %v255_v30 }
  0x9f   : > { %v349_v33 = vmax.f32 %v338_v28, 0.0  ;;  %v346_v45 = vmax.f32 %v329_v38, 0.0 }
  0xa0   : > { %v322_v25 = vpop.f32.mrf.mxu0 }
  0xa1   : > { %v323_v46 = vadd.f32 %v322_v25, %v245_v41 }
  0xa3   : > { %v344_v49 = vmax.f32 %v323_v46, 0.0 }
  0xa4   : > { %v331_v26 = vpop.f32.mrf.mxu2  ;;  %v340_v27 = vpop.f32.mrf.mxu3 }
  0xa5   : > { %v341_v29 = vadd.f32 %v340_v27, %v275_v19  ;;  %v332_v35 = vadd.f32 %v331_v26, %v260_v32 }
  0xa7   : > { %v350_v31 = vmax.f32 %v341_v29, 0.0  ;;  %v347_v42 = vmax.f32 %v332_v35, 0.0 }
  0xa8   : > { %v325_v37 = vpop.f32.mrf.mxu0 }
  0xa9   : > { %370 = vmatpush.msra.mxu1 %v350_v31  ;;  %v326_v43 = vadd.f32 %v325_v37, %v250_v40 }
  0xab   : > { %371 = vmatpush.msra.mxu1 %v349_v33  ;;  %v345_v48 = vmax.f32 %v326_v43, 0.0 }
  0xac   : > { %v334_v34 = vpop.f32.mrf.mxu2 }
  0xad   : > { %v335_v36 = vadd.f32 %v334_v34, %v265_v23 }
  0xaf   : > { %v348_v39 = vmax.f32 %v335_v36, 0.0 }
  0xb1   : > { %372 = vmatpush.msra.mxu1 %v348_v39 }
  0xb3   : > { %373 = vmatpush.msra.mxu1 %v347_v42 }
  0xb5   : > { %374 = vmatpush.msra.mxu1 %v346_v45 }
  0xb7   : > { %375 = vmatpush.msra.mxu1 %v345_v48 }
  0xb9   : > { %376 = vmatpush.msra.mxu1 %v344_v49 }
  0xbb   : > { %377 = vmatpush.msra.mxu1 %v343_v50 }
  0xbc   : > { %472 = vmatmul.msk.f32.vlgmr.msra.gmra.mxu1 %vm358_vm1, %v351_v51 }
 0x139   : > { %v379_v53 = vpop.f32.mrf.mxu1 }
 0x13a   : > { %v380_v54 = vadd.f32 %v379_v53, %v356_v52 }
 0x13c   : > { %382 = vst [vmem:[%s215_s26] sm:$0xff] %v380_v54 }
 0x13d   : > { %549 = shalt.err (!%p546_p3)
}
 0x13e   : > { %479 = dma.vmem_to_hbm [thread:$0]  (%p655_p5), %s397_s30, 128, %s399_s6, %s384_s7  }
 0x13f PF: > { %p485_p4 = scmp.ge.s32.totalorder %s584_s21, 2  ;;  %s410_s14 = sand.u32 1, %s572_s18  }
 0x140   : > { %s411_s15 = scalar_lea.sflag [#allocation3], %s410_s14 }
 0x141   : > { %p482_p7 = pnand %p485_p4, %p659_p6 }
 0x143   : > { %p483_p8 = pneg %p482_p7 }
 0x145   : > { %567 = dma.done.wait (%p483_p8), %s411_s15, 128  }
 0x146   : > { %569 = vsyncadd (%p483_p8), %s411_s15, 4294967168  ;;  %p15_p9 = scmp.ge.s32.totalorder %s642_s24, 4   ;;  %s772_s18 = smov %s576_s19 }
 0x147   : > { %s773_s19 = smov %s580_s20  ;;  %s774_s20 = smov %s653_s27 }
 0x148   : > { %s775_s21 = smov %s642_s24  ;;  %17 = sbr.rel (!%p15_p9) target bundleno = 3 (0x3), region = 75 }
 0x14d   :  { %417 = vsyncpa [#allocation3], 1 }
 0x14e   :  { %419 = vsyncpa [#allocation3 + $0x1], 1 }

</bundles_post_ra>
